<compile_context>
chip_gen: v5e
topology: v5e:2x2
jax: 0.10.0
libtpu: 0.0.40
codegen_flags: <defaults>
</compile_context>

<pallas_src>
import jax
import jax.numpy as jnp
from jax.experimental import pallas as pl
from jax.experimental.pallas import tpu as pltpu

HIDDEN = 256
OUT_PAD = 128          # lane-dense padded width of the scalar critic output
MAX_SINGLE_TILE = 512  # largest batch handled as a single grid step
BIG_TILE = 512         # row tile for batches beyond MAX_SINGLE_TILE


def _round_up(x, m):
    return (x + m - 1) // m * m


def _critic_kernel(sg_ref, a_ref,
                   w0s_ref, w0a_ref, b0_ref,
                   w1_ref, b1_ref,
                   w2_ref, b2_ref,
                   w3_ref, b3_ref,
                   w4_ref, b4_ref,
                   out_ref):
    """relu(sg@W0s + a@W0a + b0) -> 3x relu(x@W + b) -> x@W4 + b4 (lane-padded)."""
    sg = sg_ref[...].astype(jnp.bfloat16)
    a = a_ref[...].astype(jnp.bfloat16)

    # Layer 0: fused concat via split matmul; f32 MXU accumulation.
    x = (jnp.dot(sg, w0s_ref[...], preferred_element_type=jnp.float32)
         + jnp.dot(a, w0a_ref[...], preferred_element_type=jnp.float32)
         + b0_ref[...])
    x = jnp.maximum(x, 0.0)

    # Hidden layers 1..3 (Python-unrolled: full LLO scheduling visibility).
    for w_ref, b_ref in ((w1_ref, b1_ref), (w2_ref, b2_ref), (w3_ref, b3_ref)):
        x = jnp.dot(x.astype(jnp.bfloat16), w_ref[...],
                    preferred_element_type=jnp.float32) + b_ref[...]
        x = jnp.maximum(x, 0.0)

    # Output layer padded to 128 lanes (cols 1..127 of W4/b4 are zero).
    out_ref[...] = (jnp.dot(x.astype(jnp.bfloat16), w4_ref[...],
                            preferred_element_type=jnp.float32) + b4_ref[...])


@jax.jit
def critic_forward(sg, a, kparams):
    """Pallas-backed CriticNetwork forward.

    sg:      (B, obs_dim + goal_dim) float32
    a:       (B, action_dim)         float32
    kparams: output of prepare_params()
    returns: (B, 1) float32 Q-values
    """
    (w0s, w0a, b0, w1, b1, w2, b2, w3, b3, w4, b4) = kparams
    B, sg_dim = sg.shape
    act_dim = a.shape[1]

    # Adaptive row tile: one tile for small/typical RL batches (avoids paying
    # the per-grid-step overhead several times for ~0.1 us of MXU work), big
    # lane-aligned tiles (megacore-parallel, pipelined) for large batches.
    if B <= MAX_SINGLE_TILE:
        TB = _round_up(B, 16)       # 16-row alignment for bf16 sublane packing
    else:
        TB = BIG_TILE
    B_pad = _round_up(B, TB)
    sg_p = jnp.pad(sg, ((0, B_pad - B), (0, 0)))
    a_p = jnp.pad(a, ((0, B_pad - B), (0, 0)))

    def resident(arr):  # full-array block, constant index_map -> stays in VMEM
        return pl.BlockSpec(arr.shape, lambda i: (0, 0))

    out = pl.pallas_call(
        _critic_kernel,
        out_shape=jax.ShapeDtypeStruct((B_pad, OUT_PAD), jnp.float32),
        grid_spec=pltpu.PrefetchScalarGridSpec(
            num_scalar_prefetch=0,
            grid=(B_pad // TB,),
            in_specs=[
                pl.BlockSpec((TB, sg_dim), lambda i: (i, 0)),
                pl.BlockSpec((TB, act_dim), lambda i: (i, 0)),
                resident(w0s), resident(w0a), resident(b0),
                resident(w1), resident(b1),
                resident(w2), resident(b2),
                resident(w3), resident(b3),
                resident(w4), resident(b4),
            ],
            out_specs=pl.BlockSpec((TB, OUT_PAD), lambda i: (i, 0)),
        ),
        compiler_params=pltpu.CompilerParams(
            dimension_semantics=("parallel",)),
    )(sg_p, a_p, w0s, w0a, b0, w1, b1, w2, b2, w3, b3, w4, b4)

    return out[:B, :1]


def init_params(key, obs_dim, action_dim, goal_dim):
    """PyTorch nn.Linear default init U[-1/sqrt(fan_in), 1/sqrt(fan_in)].

    Weights are stored transposed: (in_features, out_features), float32.
    """
    in_dim = obs_dim + goal_dim + action_dim
    dims = [(in_dim, HIDDEN), (HIDDEN, HIDDEN), (HIDDEN, HIDDEN),
            (HIDDEN, HIDDEN), (HIDDEN, 1)]
    params = []
    for fan_in, fan_out in dims:
        key, kw, kb = jax.random.split(key, 3)
        bound = 1.0 / jnp.sqrt(jnp.float32(fan_in))
        w = jax.random.uniform(kw, (fan_in, fan_out), jnp.float32, -bound, bound)
        b = jax.random.uniform(kb, (fan_out,), jnp.float32, -bound, bound)
        params.append((w, b))
    return params


def prepare_params(params, sg_dim):
    """Convert f32 (in,out) params to kernel layout: bf16 weights, layer-0
    weight split at sg_dim (fused concat), last layer zero-padded to 128 lanes,
    biases as (1, out) f32."""
    (w0, b0), (w1, b1), (w2, b2), (w3, b3), (w4, b4) = params
    w0 = w0.astype(jnp.bfloat16)
    w0s, w0a = w0[:sg_dim], w0[sg_dim:]
    w4p = jnp.pad(w4.astype(jnp.bfloat16), ((0, 0), (0, OUT_PAD - w4.shape[1])))
    b4p = jnp.pad(b4.reshape(1, -1), ((0, 0), (0, OUT_PAD - b4.shape[0])))
    return (w0s, w0a, b0.reshape(1, -1),
            w1.astype(jnp.bfloat16), b1.reshape(1, -1),
            w2.astype(jnp.bfloat16), b2.reshape(1, -1),
            w3.astype(jnp.bfloat16), b3.reshape(1, -1),
            w4p, b4p)


def reference_forward(sg, a, params):
    """Pure-JAX reference with the same bf16 weight/activation rounding."""
    x = jnp.concatenate([sg, a], axis=1)
    for (w, b) in params[:-1]:
        x = jnp.maximum(
            jnp.dot(x.astype(jnp.bfloat16), w.astype(jnp.bfloat16),
                    preferred_element_type=jnp.float32) + b, 0.0)
    w, b = params[-1]
    return jnp.dot(x.astype(jnp.bfloat16), w.astype(jnp.bfloat16),
                   preferred_element_type=jnp.float32) + b


if __name__ == "__main__":
    key = jax.random.PRNGKey(0)
    obs_dim, goal_dim, action_dim = 10, 3, 4
    batch = 2
    sg_dim = obs_dim + goal_dim

    key, k_sg, k_a, k_par = jax.random.split(key, 4)
    sg = jax.random.normal(k_sg, (batch, sg_dim), jnp.float32)
    a = jax.random.uniform(k_a, (batch, action_dim), jnp.float32, -1.0, 1.0)

    params = init_params(k_par, obs_dim, action_dim, goal_dim)
    kparams = prepare_params(params, sg_dim)

    out = critic_forward(sg, a, kparams)
    out = jax.block_until_ready(out)

    ref = reference_forward(sg, a, params)
    assert out.shape == (batch, 1), out.shape
    assert jnp.allclose(out, ref, atol=1e-2, rtol=1e-2), (out, ref)

    print("KERNEL_OK")
</pallas_src>

<mosaic_0001>
module attributes {stable_mosaic.version = 11 : i64} {
  func.func @_critic_kernel(%arg0: i32, %arg1: memref<16x13xf32, #tpu.memory_space<vmem>>, %arg2: memref<16x4xf32, #tpu.memory_space<vmem>>, %arg3: memref<13x256xbf16, #tpu.memory_space<vmem>>, %arg4: memref<4x256xbf16, #tpu.memory_space<vmem>>, %arg5: memref<1x256xf32, #tpu.memory_space<vmem>>, %arg6: memref<256x256xbf16, #tpu.memory_space<vmem>>, %arg7: memref<1x256xf32, #tpu.memory_space<vmem>>, %arg8: memref<256x256xbf16, #tpu.memory_space<vmem>>, %arg9: memref<1x256xf32, #tpu.memory_space<vmem>>, %arg10: memref<256x256xbf16, #tpu.memory_space<vmem>>, %arg11: memref<1x256xf32, #tpu.memory_space<vmem>>, %arg12: memref<256x128xbf16, #tpu.memory_space<vmem>>, %arg13: memref<1x128xf32, #tpu.memory_space<vmem>>, %arg14: memref<16x128xf32, #tpu.memory_space<vmem>>) attributes {dimension_semantics = [#tpu.dimension_semantics<parallel>], iteration_bounds = array<i64: 1>, scalar_prefetch = 0 : i64, scratch_operands = 0 : i64, tpu.core_type = #tpu.core_type<tc>, window_params = [{transform_indices = @transform_0, window_bounds = array<i64: 16, 13>}, {transform_indices = @transform_1, window_bounds = array<i64: 16, 4>}, {pipeline_mode = #tpu.pipeline_mode<synchronous>, transform_indices = @transform_2, window_bounds = array<i64: 13, 256>}, {pipeline_mode = #tpu.pipeline_mode<synchronous>, transform_indices = @transform_3, window_bounds = array<i64: 4, 256>}, {pipeline_mode = #tpu.pipeline_mode<synchronous>, transform_indices = @transform_4, window_bounds = array<i64: 1, 256>}, {pipeline_mode = #tpu.pipeline_mode<synchronous>, transform_indices = @transform_5, window_bounds = array<i64: 256, 256>}, {pipeline_mode = #tpu.pipeline_mode<synchronous>, transform_indices = @transform_6, window_bounds = array<i64: 1, 256>}, {pipeline_mode = #tpu.pipeline_mode<synchronous>, transform_indices = @transform_7, window_bounds = array<i64: 256, 256>}, {pipeline_mode = #tpu.pipeline_mode<synchronous>, transform_indices = @transform_8, window_bounds = array<i64: 1, 256>}, {pipeline_mode = #tpu.pipeline_mode<synchronous>, transform_indices = @transform_9, window_bounds = array<i64: 256, 256>}, {pipeline_mode = #tpu.pipeline_mode<synchronous>, transform_indices = @transform_10, window_bounds = array<i64: 1, 256>}, {pipeline_mode = #tpu.pipeline_mode<synchronous>, transform_indices = @transform_11, window_bounds = array<i64: 256, 128>}, {pipeline_mode = #tpu.pipeline_mode<synchronous>, transform_indices = @transform_12, window_bounds = array<i64: 1, 128>}, {transform_indices = @transform_13, window_bounds = array<i64: 16, 128>}]} {
    %c0 = arith.constant 0 : index
    %c0_0 = arith.constant 0 : index
    %0 = vector.load %arg1[%c0, %c0_0] : memref<16x13xf32, #tpu.memory_space<vmem>>, vector<16x13xf32>
    %1 = arith.truncf %0 : vector<16x13xf32> to vector<16x13xbf16>
    %c0_1 = arith.constant 0 : index
    %c0_2 = arith.constant 0 : index
    %2 = vector.load %arg2[%c0_1, %c0_2] : memref<16x4xf32, #tpu.memory_space<vmem>>, vector<16x4xf32>
    %3 = arith.truncf %2 : vector<16x4xf32> to vector<16x4xbf16>
    %c0_3 = arith.constant 0 : index
    %c0_4 = arith.constant 0 : index
    %4 = vector.load %arg3[%c0_3, %c0_4] : memref<13x256xbf16, #tpu.memory_space<vmem>>, vector<13x256xbf16>
    %cst = arith.constant dense<0.000000e+00> : vector<16x256xf32>
    %5 = tpu.matmul %1, %4, %cst {dimension_numbers = #tpu.dot_dimension_numbers<[1], [0], [0], [1], [0, 0, 1, 1], [], []>} : vector<16x13xbf16>, vector<13x256xbf16>, vector<16x256xf32> -> vector<16x256xf32>
    %c0_5 = arith.constant 0 : index
    %c0_6 = arith.constant 0 : index
    %6 = vector.load %arg4[%c0_5, %c0_6] : memref<4x256xbf16, #tpu.memory_space<vmem>>, vector<4x256xbf16>
    %cst_7 = arith.constant dense<0.000000e+00> : vector<16x256xf32>
    %7 = tpu.matmul %3, %6, %cst_7 {dimension_numbers = #tpu.dot_dimension_numbers<[1], [0], [0], [1], [0, 0, 1, 1], [], []>} : vector<16x4xbf16>, vector<4x256xbf16>, vector<16x256xf32> -> vector<16x256xf32>
    %8 = arith.addf %5, %7 : vector<16x256xf32>
    %c0_8 = arith.constant 0 : index
    %c0_9 = arith.constant 0 : index
    %9 = vector.load %arg5[%c0_8, %c0_9] : memref<1x256xf32, #tpu.memory_space<vmem>>, vector<1x256xf32>
    %10 = vector.broadcast %9 : vector<1x256xf32> to vector<16x256xf32>
    %11 = arith.addf %8, %10 : vector<16x256xf32>
    %cst_10 = arith.constant 0.000000e+00 : f32
    %12 = vector.broadcast %cst_10 : f32 to vector<16x256xf32>
    %13 = arith.maximumf %11, %12 : vector<16x256xf32>
    %14 = arith.truncf %13 : vector<16x256xf32> to vector<16x256xbf16>
    %c0_11 = arith.constant 0 : index
    %c0_12 = arith.constant 0 : index
    %15 = vector.load %arg6[%c0_11, %c0_12] : memref<256x256xbf16, #tpu.memory_space<vmem>>, vector<256x256xbf16>
    %cst_13 = arith.constant dense<0.000000e+00> : vector<16x256xf32>
    %16 = tpu.matmul %14, %15, %cst_13 {dimension_numbers = #tpu.dot_dimension_numbers<[1], [0], [0], [1], [0, 0, 1, 1], [], []>} : vector<16x256xbf16>, vector<256x256xbf16>, vector<16x256xf32> -> vector<16x256xf32>
    %c0_14 = arith.constant 0 : index
    %c0_15 = arith.constant 0 : index
    %17 = vector.load %arg7[%c0_14, %c0_15] : memref<1x256xf32, #tpu.memory_space<vmem>>, vector<1x256xf32>
    %18 = vector.broadcast %17 : vector<1x256xf32> to vector<16x256xf32>
    %19 = arith.addf %16, %18 : vector<16x256xf32>
    %cst_16 = arith.constant 0.000000e+00 : f32
    %20 = vector.broadcast %cst_16 : f32 to vector<16x256xf32>
    %21 = arith.maximumf %19, %20 : vector<16x256xf32>
    %22 = arith.truncf %21 : vector<16x256xf32> to vector<16x256xbf16>
    %c0_17 = arith.constant 0 : index
    %c0_18 = arith.constant 0 : index
    %23 = vector.load %arg8[%c0_17, %c0_18] : memref<256x256xbf16, #tpu.memory_space<vmem>>, vector<256x256xbf16>
    %cst_19 = arith.constant dense<0.000000e+00> : vector<16x256xf32>
    %24 = tpu.matmul %22, %23, %cst_19 {dimension_numbers = #tpu.dot_dimension_numbers<[1], [0], [0], [1], [0, 0, 1, 1], [], []>} : vector<16x256xbf16>, vector<256x256xbf16>, vector<16x256xf32> -> vector<16x256xf32>
    %c0_20 = arith.constant 0 : index
    %c0_21 = arith.constant 0 : index
    %25 = vector.load %arg9[%c0_20, %c0_21] : memref<1x256xf32, #tpu.memory_space<vmem>>, vector<1x256xf32>
    %26 = vector.broadcast %25 : vector<1x256xf32> to vector<16x256xf32>
    %27 = arith.addf %24, %26 : vector<16x256xf32>
    %cst_22 = arith.constant 0.000000e+00 : f32
    %28 = vector.broadcast %cst_22 : f32 to vector<16x256xf32>
    %29 = arith.maximumf %27, %28 : vector<16x256xf32>
    %30 = arith.truncf %29 : vector<16x256xf32> to vector<16x256xbf16>
    %c0_23 = arith.constant 0 : index
    %c0_24 = arith.constant 0 : index
    %31 = vector.load %arg10[%c0_23, %c0_24] : memref<256x256xbf16, #tpu.memory_space<vmem>>, vector<256x256xbf16>
    %cst_25 = arith.constant dense<0.000000e+00> : vector<16x256xf32>
    %32 = tpu.matmul %30, %31, %cst_25 {dimension_numbers = #tpu.dot_dimension_numbers<[1], [0], [0], [1], [0, 0, 1, 1], [], []>} : vector<16x256xbf16>, vector<256x256xbf16>, vector<16x256xf32> -> vector<16x256xf32>
    %c0_26 = arith.constant 0 : index
    %c0_27 = arith.constant 0 : index
    %33 = vector.load %arg11[%c0_26, %c0_27] : memref<1x256xf32, #tpu.memory_space<vmem>>, vector<1x256xf32>
    %34 = vector.broadcast %33 : vector<1x256xf32> to vector<16x256xf32>
    %35 = arith.addf %32, %34 : vector<16x256xf32>
    %cst_28 = arith.constant 0.000000e+00 : f32
    %36 = vector.broadcast %cst_28 : f32 to vector<16x256xf32>
    %37 = arith.maximumf %35, %36 : vector<16x256xf32>
    %38 = arith.truncf %37 : vector<16x256xf32> to vector<16x256xbf16>
    %c0_29 = arith.constant 0 : index
    %c0_30 = arith.constant 0 : index
    %39 = vector.load %arg12[%c0_29, %c0_30] : memref<256x128xbf16, #tpu.memory_space<vmem>>, vector<256x128xbf16>
    %cst_31 = arith.constant dense<0.000000e+00> : vector<16x128xf32>
    %40 = tpu.matmul %38, %39, %cst_31 {dimension_numbers = #tpu.dot_dimension_numbers<[1], [0], [0], [1], [0, 0, 1, 1], [], []>} : vector<16x256xbf16>, vector<256x128xbf16>, vector<16x128xf32> -> vector<16x128xf32>
    %c0_32 = arith.constant 0 : index
    %c0_33 = arith.constant 0 : index
    %41 = vector.load %arg13[%c0_32, %c0_33] : memref<1x128xf32, #tpu.memory_space<vmem>>, vector<1x128xf32>
    %42 = vector.broadcast %41 : vector<1x128xf32> to vector<16x128xf32>
    %43 = arith.addf %40, %42 : vector<16x128xf32>
    %c0_34 = arith.constant 0 : index
    %c0_35 = arith.constant 0 : index
    %44 = vector.load %arg14[%c0_34, %c0_35] : memref<16x128xf32, #tpu.memory_space<vmem>>, vector<16x128xf32>
    tpu.vector_store %arg14[%c0_34, %c0_35], %43 {strides = array<i32>} : memref<16x128xf32, #tpu.memory_space<vmem>>, vector<16x128xf32>,
    return
  }
  func.func @transform_0(%arg0: i32) -> (i32, i32) {
    %c0_i32 = arith.constant 0 : i32
    %c0_i32_0 = arith.constant 0 : i32
    return %arg0, %c0_i32 : i32, i32
  }
  func.func @transform_1(%arg0: i32) -> (i32, i32) {
    %c0_i32 = arith.constant 0 : i32
    %c0_i32_0 = arith.constant 0 : i32
    return %arg0, %c0_i32 : i32, i32
  }
  func.func @transform_2(%arg0: i32) -> (i32, i32) {
    %c0_i32 = arith.constant 0 : i32
    %c0_i32_0 = arith.constant 0 : i32
    %c0_i32_1 = arith.constant 0 : i32
    return %c0_i32, %c0_i32_0 : i32, i32
  }
  func.func @transform_3(%arg0: i32) -> (i32, i32) {
    %c0_i32 = arith.constant 0 : i32
    %c0_i32_0 = arith.constant 0 : i32
    %c0_i32_1 = arith.constant 0 : i32
    return %c0_i32, %c0_i32_0 : i32, i32
  }
  func.func @transform_4(%arg0: i32) -> (i32, i32) {
    %c0_i32 = arith.constant 0 : i32
    %c0_i32_0 = arith.constant 0 : i32
    %c0_i32_1 = arith.constant 0 : i32
    return %c0_i32, %c0_i32_0 : i32, i32
  }
  func.func @transform_5(%arg0: i32) -> (i32, i32) {
    %c0_i32 = arith.constant 0 : i32
    %c0_i32_0 = arith.constant 0 : i32
    %c0_i32_1 = arith.constant 0 : i32
    return %c0_i32, %c0_i32_0 : i32, i32
  }
  func.func @transform_6(%arg0: i32) -> (i32, i32) {
    %c0_i32 = arith.constant 0 : i32
    %c0_i32_0 = arith.constant 0 : i32
    %c0_i32_1 = arith.constant 0 : i32
    return %c0_i32, %c0_i32_0 : i32, i32
  }
  func.func @transform_7(%arg0: i32) -> (i32, i32) {
    %c0_i32 = arith.constant 0 : i32
    %c0_i32_0 = arith.constant 0 : i32
    %c0_i32_1 = arith.constant 0 : i32
    return %c0_i32, %c0_i32_0 : i32, i32
  }
  func.func @transform_8(%arg0: i32) -> (i32, i32) {
    %c0_i32 = arith.constant 0 : i32
    %c0_i32_0 = arith.constant 0 : i32
    %c0_i32_1 = arith.constant 0 : i32
    return %c0_i32, %c0_i32_0 : i32, i32
  }
  func.func @transform_9(%arg0: i32) -> (i32, i32) {
    %c0_i32 = arith.constant 0 : i32
    %c0_i32_0 = arith.constant 0 : i32
    %c0_i32_1 = arith.constant 0 : i32
    return %c0_i32, %c0_i32_0 : i32, i32
  }
  func.func @transform_10(%arg0: i32) -> (i32, i32) {
    %c0_i32 = arith.constant 0 : i32
    %c0_i32_0 = arith.constant 0 : i32
    %c0_i32_1 = arith.constant 0 : i32
    return %c0_i32, %c0_i32_0 : i32, i32
  }
  func.func @transform_11(%arg0: i32) -> (i32, i32) {
    %c0_i32 = arith.constant 0 : i32
    %c0_i32_0 = arith.constant 0 : i32
    %c0_i32_1 = arith.constant 0 : i32
    return %c0_i32, %c0_i32_0 : i32, i32
  }
  func.func @transform_12(%arg0: i32) -> (i32, i32) {
    %c0_i32 = arith.constant 0 : i32
    %c0_i32_0 = arith.constant 0 : i32
    %c0_i32_1 = arith.constant 0 : i32
    return %c0_i32, %c0_i32_0 : i32, i32
  }
  func.func @transform_13(%arg0: i32) -> (i32, i32) {
    %c0_i32 = arith.constant 0 : i32
    %c0_i32_0 = arith.constant 0 : i32
    return %arg0, %c0_i32 : i32, i32
  }
}

</mosaic_0001>

<bundles_post_ra>
// kernel: critic_forward.1
= control target key start
LH: loop header
LB: loop body
LE: loop exit
PB: predicated region body
PF: predicated region fallthrough
CT: control target
= control target key end

     0   :  { %18 = vsyncpa [#allocation3], 0  ;;  %s1998_s0 = inlined_call_operand.vmem [shape: f32[16,13], index: 0, kind: input, shape index: {}]   ;;  %s1999_s1 = inlined_call_operand.vmem [shape: f32[16,4], index: 1, kind: input, shape index: {}]   ;;  %s2000_s2 = inlined_call_operand.vmem [shape: bf16[13,256], index: 2, kind: input, shape index: {}]   ;;  %s2001_s3 = inlined_call_operand.vmem [shape: bf16[4,256], index: 3, kind: input, shape index: {}]   ;;  %s2002_s4 = inlined_call_operand.vmem [shape: f32[1,256], index: 4, kind: input, shape index: {}]   ;;  %s2003_s5 = inlined_call_operand.hbm [shape: bf16[256,256], index: 5, kind: input, shape index: {}]   ;;  %s2004_s6 = inlined_call_operand.vmem [shape: f32[1,256], index: 6, kind: input, shape index: {}]   ;;  %s2005_s7 = inlined_call_operand.hbm [shape: bf16[256,256], index: 7, kind: input, shape index: {}]   ;;  %s2006_s8 = inlined_call_operand.vmem [shape: f32[1,256], index: 8, kind: input, shape index: {}]   ;;  %s2007_s9 = inlined_call_operand.hbm [shape: bf16[256,256], index: 9, kind: input, shape index: {}]   ;;  %s2008_s10 = inlined_call_operand.vmem [shape: f32[1,256], index: 10, kind: input, shape index: {}]   ;;  %s2009_s11 = inlined_call_operand.hbm [shape: bf16[256,128], index: 11, kind: input, shape index: {}]   ;;  %s2010_s12 = inlined_call_operand.vmem [shape: f32[1,128], index: 12, kind: input, shape index: {}]   ;;  %s2011_s13 = inlined_call_operand.vmem [shape: f32[16,128], index: 13, kind: output, shape index: {}]  }
   0x1   :  { %19 = vsyncpa [#allocation5], 0 }
   0x2   :  { %20 = vsyncpa [#allocation8], 0  ;;  %s50_s27 = sshll.u32 %s2005_s7, 4  ;;  %s1859_s28 = smov [#allocation4]   ;;  %s51_s27 = int_to_ptr.hbm [resolvable:$true] %s50_s27 }
   0x3   :  { %s52_s29 = sshll.u32 %s1859_s28, 4  ;;  %s35_s15 = sshll.u32 %s2003_s5, 4  ;;  %s53_s29 = int_to_ptr.vmem [resolvable:$true] %s52_s29  ;;  %s36_s15 = int_to_ptr.hbm [resolvable:$true] %s35_s15 }
   0x4   :  { %s1860_s16 = smov 128   ;;  %s1861_s17 = smov 8  }
   0x5   :  { %58 = dma.hbm_to_vmem [thread:$0]  %s51_s27, 4096, %s53_s29, [#allocation5], %s1860_s16, %s1860_s16, %s1861_s17  }
   0x6   :  { %s1862_s18 = smov [#allocation2]   ;;  %s65_s22 = sshll.u32 %s2007_s9, 4  ;;  %s66_s22 = int_to_ptr.hbm [resolvable:$true] %s65_s22 }
   0x7   :  { %s37_s19 = sshll.u32 %s1862_s18, 4  ;;  %s80_s24 = sshll.u32 %s2009_s11, 4  ;;  %s38_s19 = int_to_ptr.vmem [resolvable:$true] %s37_s19  ;;  %s81_s24 = int_to_ptr.hbm [resolvable:$true] %s80_s24 }
   0x8   :  { %43 = dma.hbm_to_vmem [thread:$0]  %s36_s15, 4096, %s38_s19, [#allocation3], %s1860_s16, %s1860_s16, %s1861_s17  }
   0x9   :  { %s1863_s25 = smov [#allocation6]   ;;  %s1864_s5 = smov [#allocation7]  }
   0xa   :  { %s67_s26 = sshll.u32 %s1863_s25, 4  ;;  %s82_s27 = sshll.u32 %s1864_s5, 4  ;;  %s68_s26 = int_to_ptr.vmem [resolvable:$true] %s67_s26  ;;  %s83_s27 = int_to_ptr.vmem [resolvable:$true] %s82_s27 }
   0xb   :  { %73 = dma.hbm_to_vmem [thread:$0]  %s66_s22, 4096, %s68_s26, [#allocation5], %s1860_s16, %s1860_s16, %s1861_s17  }
   0xc   :  { %s1865_s28 = smov 64   ;;  %s1866_s29 = smov 4  }
   0xd   :  { %88 = dma.hbm_to_vmem [thread:$0]  %s81_s24, 2048, %s83_s27, [#allocation8], %s1865_s28, %s1865_s28, %s1866_s29  }
   0xe   :  { %1853 = dma.done.wait [#allocation3], 4096  }
   0xf   :  { %1854 = vsyncadd [#allocation3], 4294963200 }
  0x10   :  { %1855 = dma.done.wait [#allocation5], 8192  }
  0x11   :  { %1856 = vsyncadd [#allocation5], 4294959104 }
  0x12   :  { %1857 = dma.done.wait [#allocation8], 2048  }
  0x13   :  { %1858 = vsyncadd [#allocation8], 4294965248  ;;  %vm170_vm0 = vcmask 1045504   ;;  %v116_v0 = vld [vmem:[%s2001_s3] sm:$0xf]  ;;  %vm171_vm1 = vcmask 1046528  }
  0x14   :  { %v1867_v1 = vmov 65535   ;;  %118 = vst [vmem:[#allocation1] ss:$4 sm:$0xff] %v116_v0  ;;  %v1177_v3 = vld [vmem:[%s2000_s2] sm:$0xf]  ;;  %vm125_vm2 = vcmask 1041408  }
  0x15   :  { %v172_v2 = vsel %vm170_vm0, 4294967295, %v1867_v1  ;;  %v1634_v4 = vld [vmem:[%s2000_s2 + $0x4] sm:$0x70]  ;;  %v1633_v5 = vld [vmem:[%s2000_s2 + $0x4] sm:$0xf]  ;;  %vm121_vm3 = vcmask 31744  }
  0x16   :  { %v1179_v6 = vld [vmem:[%s2000_s2 + $0x8] sm:$0x70]  ;;  %v1178_v7 = vor.u32 %v1634_v4, %v1177_v3  ;;  %v173_v9 = vsel %vm171_vm1, %v172_v2, 0  ;;  %v111_v10 = vld [vmem:[%s1999_s1] sm:$0xff]  ;;  %vm166_vm4 = vcmask 105472  }
  0x17   :  { %v1182_v8 = vor.u32 %v1633_v5, %v1179_v6  ;;  %v112_v11 = vld [vmem:[%s1999_s1 + $0x8] sm:$0xff]  ;;  %v108_v19 = vld [vmem:[%s1998_s0] sm:$0xff]  ;;  %v1243_v22 = vld [vmem:[#allocation2 + $0x70] sm:$0xf] }
  0x18   :  { %v175_v12 = vand.u32 %v1178_v7, %v173_v9  ;;  %v113_v18 = vpack.c.bf16 %v112_v11, %v111_v10  ;;  %v109_v20 = vld [vmem:[%s1998_s0 + $0x8] sm:$0xff]  ;;  %v1650_v23 = vld [vmem:[#allocation2 + $0x74] sm:$0xf0]  ;;  %v1307_v24 = vld [vmem:[#allocation2 + $0xf0] sm:$0xf] }
  0x19   :  { %v178_v13 = vand.u32 %v1182_v8, %v173_v9  ;;  %v110_v21 = vpack.c.bf16 %v109_v20, %v108_v19  ;;  %v1244_v25 = vor.u32 %v1650_v23, %v1243_v22  ;;  %v1666_v26 = vld [vmem:[#allocation2 + $0xf4] sm:$0xf0]  ;;  %v1649_v27 = vld [vmem:[#allocation2 + $0x74] sm:$0xf]  ;;  %v1245_v28 = vld [vmem:[#allocation2 + $0x78] sm:$0xf0] }
  0x1a   :  { %v1308_v29 = vor.u32 %v1666_v26, %v1307_v24  ;;  %v1248_v30 = vor.u32 %v1649_v27, %v1245_v28  ;;  %v1665_v31 = vld [vmem:[#allocation2 + $0xf4] sm:$0xf]  ;;  %v1309_v32 = vld [vmem:[#allocation2 + $0xf8] sm:$0xf0]  ;;  %v1235_v33 = vld [vmem:[#allocation2 + $0x60] sm:$0xf] }
  0x1b   :  { %v119_v14 = vld.sshfl [vmem:[#allocation1] sm:$0xff pattern:$0x73625140]  ;;  %v120_v15 = vld.sshfl [vmem:[#allocation1 + $0x8] sm:$0xff pattern:$0x73625140]  ;;  %422 = vmatpush.bf16.msra.mxu0 %v1244_v25  ;;  %v1312_v34 = vor.u32 %v1665_v31, %v1309_v32 }
  0x1c   :  { %v126_v16 = vsel %vm125_vm2, %v119_v14, 0  ;;  %v128_v17 = vsel %vm125_vm2, %v120_v15, 0  ;;  %v1648_v35 = vld [vmem:[#allocation2 + $0x64] sm:$0xf0]  ;;  %v1299_v36 = vld [vmem:[#allocation2 + $0xe0] sm:$0xf]  ;;  %436 = vmatpush.bf16.msra.mxu1 %v1308_v29 }
  0x1d   :  { %137 = vmatpush.bf16.msra.mxu2 %v126_v16  ;;  %151 = vmatpush.bf16.msra.mxu3 %v128_v17  ;;  %v1664_v37 = vld [vmem:[#allocation2 + $0xe4] sm:$0xf0]  ;;  %v1236_v38 = vor.u32 %v1648_v35, %v1235_v33  ;;  %v1647_v40 = vld [vmem:[#allocation2 + $0x64] sm:$0xf]  ;;  %v1237_v41 = vld [vmem:[#allocation2 + $0x68] sm:$0xf0] }
  0x1e   :  { %v1300_v39 = vor.u32 %v1664_v37, %v1299_v36  ;;  %v1663_v42 = vld [vmem:[#allocation2 + $0xe4] sm:$0xf]  ;;  %v1240_v43 = vor.u32 %v1647_v40, %v1237_v41  ;;  %v1301_v44 = vld [vmem:[#allocation2 + $0xe8] sm:$0xf0]  ;;  %v1227_v46 = vld [vmem:[#allocation2 + $0x50] sm:$0xf] }
  0x1f   :  { %v1304_v45 = vor.u32 %v1663_v42, %v1301_v44  ;;  %423 = vmatpush.bf16.msra.mxu0 %v1236_v38  ;;  %v1646_v47 = vld [vmem:[#allocation2 + $0x54] sm:$0xf0]  ;;  %v1291_v48 = vld [vmem:[#allocation2 + $0xd0] sm:$0xf]  ;;  %v1645_v51 = vld [vmem:[#allocation2 + $0x54] sm:$0xf] }
  0x20   :  { %1173 = vmatmul.msk.bf16.vlgmr.msra.gmra.mxu2 %vm121_vm3, %v113_v18  ;;  %1174 = vmatmul.msk.bf16.vlgmr.msra.gmra.mxu3 %vm121_vm3, %v113_v18  ;;  %v1228_v49 = vor.u32 %v1646_v47, %v1227_v46  ;;  %v1662_v50 = vld [vmem:[#allocation2 + $0xd4] sm:$0xf0]  ;;  %v1229_v52 = vld [vmem:[#allocation2 + $0x58] sm:$0xf0]  ;;  %v1661_v55 = vld [vmem:[#allocation2 + $0xd4] sm:$0xf] }
  0x21   :  { %187 = vmatpush.bf16.msrb.mxu2 %v175_v12  ;;  %201 = vmatpush.bf16.msrb.mxu3 %v178_v13  ;;  %v1292_v53 = vor.u32 %v1662_v50, %v1291_v48  ;;  %v1232_v54 = vor.u32 %v1645_v51, %v1229_v52  ;;  %v1293_v56 = vld [vmem:[#allocation2 + $0xd8] sm:$0xf0]  ;;  %v1219_v57 = vld [vmem:[#allocation2 + $0x40] sm:$0xf]  ;;  %v1644_v59 = vld [vmem:[#allocation2 + $0x44] sm:$0xf0] }
  0x22   :  { %437 = vmatpush.bf16.msra.mxu1 %v1300_v39  ;;  %v1296_v58 = vor.u32 %v1661_v55, %v1293_v56  ;;  %v1283_v60 = vld [vmem:[#allocation2 + $0xc0] sm:$0xf]  ;;  %v1660_v61 = vld [vmem:[#allocation2 + $0xc4] sm:$0xf0]  ;;  %v1220_v62 = vor.u32 %v1644_v59, %v1219_v57  ;;  %v1643_v0 = vld [vmem:[#allocation2 + $0x44] sm:$0xf] }
  0x23   :  { %424 = vmatpush.bf16.msra.mxu0 %v1228_v49  ;;  %v1284_v63 = vor.u32 %v1660_v61, %v1283_v60  ;;  %v1221_v1 = vld [vmem:[#allocation2 + $0x48] sm:$0xf0]  ;;  %v1659_v2 = vld [vmem:[#allocation2 + $0xc4] sm:$0xf]  ;;  %v1211_v6 = vld [vmem:[#allocation2 + $0x30] sm:$0xf] }
  0x24   :  { %v1224_v3 = vor.u32 %v1643_v0, %v1221_v1  ;;  %v1285_v4 = vld [vmem:[#allocation2 + $0xc8] sm:$0xf0]  ;;  %v1642_v7 = vld [vmem:[#allocation2 + $0x34] sm:$0xf0]  ;;  %v1275_v8 = vld [vmem:[#allocation2 + $0xb0] sm:$0xf] }
  0x25   :  { %450 = vmatpush.bf16.msra.mxu2 %v1248_v30  ;;  %464 = vmatpush.bf16.msra.mxu3 %v1312_v34  ;;  %v1288_v5 = vor.u32 %v1659_v2, %v1285_v4  ;;  %v1212_v9 = vor.u32 %v1642_v7, %v1211_v6  ;;  %v1658_v10 = vld [vmem:[#allocation2 + $0xb4] sm:$0xf0]  ;;  %v1641_v11 = vld [vmem:[#allocation2 + $0x34] sm:$0xf]  ;;  %v1213_v13 = vld [vmem:[#allocation2 + $0x38] sm:$0xf0] }
  0x26   :  { %438 = vmatpush.bf16.msra.mxu1 %v1292_v53  ;;  %v1276_v12 = vor.u32 %v1658_v10, %v1275_v8  ;;  %v1657_v14 = vld [vmem:[#allocation2 + $0xb4] sm:$0xf]  ;;  %v1216_v15 = vor.u32 %v1641_v11, %v1213_v13  ;;  %v1277_v16 = vld [vmem:[#allocation2 + $0xb8] sm:$0xf0]  ;;  %v1203_v18 = vld [vmem:[#allocation2 + $0x20] sm:$0xf] }
  0x27   :  { %425 = vmatpush.bf16.msra.mxu0 %v1220_v62  ;;  %v1280_v17 = vor.u32 %v1657_v14, %v1277_v16  ;;  %v1640_v19 = vld [vmem:[#allocation2 + $0x24] sm:$0xf0]  ;;  %v1267_v20 = vld [vmem:[#allocation2 + $0xa0] sm:$0xf]  ;;  %v1639_v23 = vld [vmem:[#allocation2 + $0x24] sm:$0xf] }
  0x28   :  { %v1656_v22 = vld [vmem:[#allocation2 + $0xa4] sm:$0xf0]  ;;  %v1205_v24 = vld [vmem:[#allocation2 + $0x28] sm:$0xf0]  ;;  %v1655_v27 = vld [vmem:[#allocation2 + $0xa4] sm:$0xf] }
  0x29   :  { %451 = vmatpush.bf16.msra.mxu2 %v1240_v43  ;;  %465 = vmatpush.bf16.msra.mxu3 %v1304_v45  ;;  %v1268_v25 = vor.u32 %v1656_v22, %v1267_v20  ;;  %v1208_v26 = vor.u32 %v1639_v23, %v1205_v24  ;;  %v1269_v28 = vld [vmem:[#allocation2 + $0xa8] sm:$0xf0]  ;;  %v1195_v30 = vld [vmem:[#allocation2 + $0x10] sm:$0xf]  ;;  %v1638_v31 = vld [vmem:[#allocation2 + $0x14] sm:$0xf0] }
  0x2a   :  { %439 = vmatpush.bf16.msra.mxu1 %v1284_v63  ;;  %v1272_v29 = vor.u32 %v1655_v27, %v1269_v28  ;;  %v1259_v32 = vld [vmem:[#allocation2 + $0x90] sm:$0xf]  ;;  %v1196_v33 = vor.u32 %v1638_v31, %v1195_v30  ;;  %v1654_v34 = vld [vmem:[#allocation2 + $0x94] sm:$0xf0]  ;;  %v1637_v35 = vld [vmem:[#allocation2 + $0x14] sm:$0xf] }
  0x2b   :  { %426 = vmatpush.bf16.msra.mxu0 %v1212_v9  ;;  %v1197_v36 = vld [vmem:[#allocation2 + $0x18] sm:$0xf0]  ;;  %v1260_v37 = vor.u32 %v1654_v34, %v1259_v32  ;;  %v1653_v39 = vld [vmem:[#allocation2 + $0x94] sm:$0xf]  ;;  %v1187_v42 = vld [vmem:[#allocation2] sm:$0xf] }
  0x2c   :  { %v1200_v38 = vor.u32 %v1637_v35, %v1197_v36  ;;  %v1261_v40 = vld [vmem:[#allocation2 + $0x98] sm:$0xf0]  ;;  %v1636_v43 = vld [vmem:[#allocation2 + $0x4] sm:$0xf0]  ;;  %v1251_v44 = vld [vmem:[#allocation2 + $0x80] sm:$0xf] }
  0x2d   :  { %452 = vmatpush.bf16.msra.mxu2 %v1232_v54  ;;  %466 = vmatpush.bf16.msra.mxu3 %v1296_v58  ;;  %v1264_v41 = vor.u32 %v1653_v39, %v1261_v40  ;;  %v1188_v45 = vor.u32 %v1636_v43, %v1187_v42  ;;  %v1652_v46 = vld [vmem:[#allocation2 + $0x84] sm:$0xf0]  ;;  %v1635_v47 = vld [vmem:[#allocation2 + $0x4] sm:$0xf]  ;;  %v1189_v48 = vld [vmem:[#allocation2 + $0x8] sm:$0xf0] }
  0x2e   :  { %440 = vmatpush.bf16.msra.mxu1 %v1276_v12  ;;  %v1252_v49 = vor.u32 %v1652_v46, %v1251_v44  ;;  %v1192_v50 = vor.u32 %v1635_v47, %v1189_v48  ;;  %v1651_v51 = vld [vmem:[#allocation2 + $0x84] sm:$0xf]  ;;  %v1253_v52 = vld [vmem:[#allocation2 + $0x88] sm:$0xf0]  ;;  %v1371_v56 = vld [vmem:[#allocation4 + $0x70] sm:$0xf] }
  0x2f   :  { %v1256_v53 = vor.u32 %v1651_v51, %v1253_v52  ;;  %v1682_v57 = vld [vmem:[#allocation4 + $0x74] sm:$0xf0]  ;;  %v1681_v58 = vld [vmem:[#allocation4 + $0x74] sm:$0xf]  ;;  %v1373_v60 = vld [vmem:[#allocation4 + $0x78] sm:$0xf0] }
  0x30   :  { %1183 = vmatmul.msk.bf16.vlgmr.msrb.gmra.mxu2 %vm166_vm4, %v110_v21  ;;  %1184 = vmatmul.msk.bf16.vlgmr.msrb.gmra.mxu3 %vm166_vm4, %v110_v21  ;;  %v1204_v21 = vor.u32 %v1640_v19, %v1203_v18  ;;  %v1372_v59 = vor.u32 %v1682_v57, %v1371_v56  ;;  %v1363_v61 = vld [vmem:[#allocation4 + $0x60] sm:$0xf]  ;;  %v1680_v62 = vld [vmem:[#allocation4 + $0x64] sm:$0xf0]  ;;  %v1376_v63 = vor.u32 %v1681_v58, %v1373_v60  ;;  %v1679_v0 = vld [vmem:[#allocation4 + $0x64] sm:$0xf] }
  0x31   :  { %453 = vmatpush.bf16.msra.mxu2 %v1224_v3  ;;  %467 = vmatpush.bf16.msra.mxu3 %v1288_v5  ;;  %v1365_v1 = vld [vmem:[#allocation4 + $0x68] sm:$0xf0]  ;;  %v1435_v2 = vld [vmem:[#allocation4 + $0xf0] sm:$0xf]  ;;  %v1364_v3 = vor.u32 %v1680_v62, %v1363_v61  ;;  %v1698_v4 = vld [vmem:[#allocation4 + $0xf4] sm:$0xf0] }
  0x32   :  { %427 = vmatpush.bf16.msra.mxu0 %v1204_v21  ;;  %441 = vmatpush.bf16.msra.mxu1 %v1268_v25  ;;  %v1697_v5 = vld [vmem:[#allocation4 + $0xf4] sm:$0xf]  ;;  %v1437_v6 = vld [vmem:[#allocation4 + $0xf8] sm:$0xf0]  ;;  %v1368_v7 = vor.u32 %v1679_v0, %v1365_v1  ;;  %v1436_v8 = vor.u32 %v1698_v4, %v1435_v2  ;;  %v1355_v10 = vld [vmem:[#allocation4 + $0x50] sm:$0xf] }
  0x33   :  { %v1440_v9 = vor.u32 %v1697_v5, %v1437_v6  ;;  %v1678_v11 = vld [vmem:[#allocation4 + $0x54] sm:$0xf0]  ;;  %v1677_v12 = vld [vmem:[#allocation4 + $0x54] sm:$0xf]  ;;  %v1357_v13 = vld [vmem:[#allocation4 + $0x58] sm:$0xf0] }
  0x34   :  { %v1427_v14 = vld [vmem:[#allocation4 + $0xe0] sm:$0xf]  ;;  %v1695_v19 = vld [vmem:[#allocation4 + $0xe4] sm:$0xf]  ;;  %v1429_v20 = vld [vmem:[#allocation4 + $0xe8] sm:$0xf0]  ;;  %v1356_v21 = vor.u32 %v1678_v11, %v1355_v10  ;;  %v1360_v23 = vor.u32 %v1677_v12, %v1357_v13 }
  0x35   :  { %454 = vmatpush.bf16.msra.mxu2 %v1216_v15  ;;  %468 = vmatpush.bf16.msra.mxu3 %v1280_v17  ;;  %v1696_v15 = vld [vmem:[#allocation4 + $0xe4] sm:$0xf0]  ;;  %v1432_v22 = vor.u32 %v1695_v19, %v1429_v20  ;;  %v1347_v24 = vld [vmem:[#allocation4 + $0x40] sm:$0xf]  ;;  %v1349_v27 = vld [vmem:[#allocation4 + $0x48] sm:$0xf0] }
  0x36   :  { %428 = vmatpush.bf16.msra.mxu0 %v1196_v33  ;;  %442 = vmatpush.bf16.msra.mxu1 %v1260_v37  ;;  %v1428_v18 = vor.u32 %v1696_v15, %v1427_v14  ;;  %v1676_v25 = vld [vmem:[#allocation4 + $0x44] sm:$0xf0]  ;;  %v208_v32 = vld [vmem:[%s2002_s4] sm:$0x3]  ;;  %v1419_v51 = vld [vmem:[#allocation4 + $0xd0] sm:$0xf] }
  0x37   :  { %v1348_v28 = vor.u32 %v1676_v25, %v1347_v24  ;;  %v210_v34 = vperm.slane %v208_v32, 0  ;;  %v211_v36 = vperm.slane %v208_v32, 1  ;;  %v1694_v52 = vld [vmem:[#allocation4 + $0xd4] sm:$0xf0]  ;;  %v1339_v57 = vld [vmem:[#allocation4 + $0x30] sm:$0xf] }
  0x38   :  { %v1674_v58 = vld [vmem:[#allocation4 + $0x34] sm:$0xf0]  ;;  %v1341_v61 = vld [vmem:[#allocation4 + $0x38] sm:$0xf0]  ;;  %v1692_v0 = vld [vmem:[#allocation4 + $0xc4] sm:$0xf0] }
  0x39   :  { %455 = vmatpush.bf16.msra.mxu2 %v1208_v26  ;;  %469 = vmatpush.bf16.msra.mxu3 %v1272_v29  ;;  %v1675_v26 = vld [vmem:[#allocation4 + $0x44] sm:$0xf]  ;;  %v1340_v60 = vor.u32 %v1674_v58, %v1339_v57  ;;  %v1331_v5 = vld [vmem:[#allocation4 + $0x20] sm:$0xf]  ;;  %v1672_v6 = vld [vmem:[#allocation4 + $0x24] sm:$0xf0] }
  0x3a   :  { %429 = vmatpush.bf16.msra.mxu0 %v1188_v45  ;;  %443 = vmatpush.bf16.msra.mxu1 %v1252_v49  ;;  %v1352_v29 = vor.u32 %v1675_v26, %v1349_v27  ;;  %v1691_v1 = vld [vmem:[#allocation4 + $0xc4] sm:$0xf]  ;;  %v1403_v11 = vld [vmem:[#allocation4 + $0xb0] sm:$0xf]  ;;  %v1690_v12 = vld [vmem:[#allocation4 + $0xb4] sm:$0xf0] }
  0x3b   :  { %v1689_v13 = vld [vmem:[#allocation4 + $0xb4] sm:$0xf]  ;;  %v1404_v14 = vor.u32 %v1690_v12, %v1403_v11  ;;  %v1405_v15 = vld [vmem:[#allocation4 + $0xb8] sm:$0xf0]  ;;  %v1688_v24 = vld [vmem:[#allocation4 + $0xa4] sm:$0xf0] }
  0x3c   :  { %v1669_v19 = vld [vmem:[#allocation4 + $0x14] sm:$0xf]  ;;  %v1687_v25 = vld [vmem:[#allocation4 + $0xa4] sm:$0xf]  ;;  %v1397_v27 = vld [vmem:[#allocation4 + $0xa8] sm:$0xf0] }
  0x3d   :  { %456 = vmatpush.bf16.msra.mxu2 %v1200_v38  ;;  %470 = vmatpush.bf16.msra.mxu3 %v1264_v41  ;;  %v1563_v57 = vld [vmem:[#allocation6 + $0xf0] sm:$0xf] }
  0x3e   :  { %682 = vmatpush.bf16.msrb.mxu0 %v1372_v59  ;;  %696 = vmatpush.bf16.msrb.mxu1 %v1436_v8  ;;  %v1673_v59 = vld [vmem:[#allocation4 + $0x34] sm:$0xf]  ;;  %v1332_v8 = vor.u32 %v1672_v6, %v1331_v5  ;;  %v256_v5 = vld [vmem:[%s2004_s6] sm:$0x3] }
  0x3f   :  { %v1344_v62 = vor.u32 %v1673_v59, %v1341_v61  ;;  %v1730_v59 = vld [vmem:[#allocation6 + $0xf4] sm:$0xf0]  ;;  %v1565_v61 = vld [vmem:[#allocation6 + $0xf8] sm:$0xf0] }
  0x41   :  { %457 = vmatpush.bf16.msra.mxu2 %v1192_v50  ;;  %471 = vmatpush.bf16.msra.mxu3 %v1256_v53  ;;  %v1693_v53 = vld [vmem:[#allocation4 + $0xd4] sm:$0xf] }
  0x42   :  { %683 = vmatpush.bf16.msrb.mxu0 %v1364_v3  ;;  %697 = vmatpush.bf16.msrb.mxu1 %v1428_v18  ;;  %v1413_v3 = vld [vmem:[#allocation4 + $0xc8] sm:$0xf0]  ;;  %v1670_v18 = vld [vmem:[#allocation4 + $0x14] sm:$0xf0] }
  0x43   :  { %v1416_v4 = vor.u32 %v1691_v1, %v1413_v3  ;;  %v1483_v1 = vld [vmem:[#allocation6 + $0x50] sm:$0xf]  ;;  %v1709_v3 = vld [vmem:[#allocation6 + $0x54] sm:$0xf] }
  0x45   :  { %710 = vmatpush.bf16.msrb.mxu2 %v1376_v63  ;;  %724 = vmatpush.bf16.msrb.mxu3 %v1440_v9  ;;  %v1411_v63 = vld [vmem:[#allocation4 + $0xc0] sm:$0xf]  ;;  %v1333_v9 = vld [vmem:[#allocation4 + $0x28] sm:$0xf0] }
  0x46   :  { %684 = vmatpush.bf16.msrb.mxu0 %v1356_v21  ;;  %v1412_v2 = vor.u32 %v1692_v0, %v1411_v63  ;;  %v1325_v21 = vld [vmem:[#allocation4 + $0x18] sm:$0xf0]  ;;  %v1564_v63 = vor.u32 %v1730_v59, %v1563_v57  ;;  %v1724_v57 = vld [vmem:[#allocation6 + $0xc4] sm:$0xf0]  ;;  %v1723_v59 = vld [vmem:[#allocation6 + $0xc4] sm:$0xf] }
  0x49   :  { %711 = vmatpush.bf16.msrb.mxu2 %v1368_v7  ;;  %725 = vmatpush.bf16.msrb.mxu3 %v1432_v22  ;;  %v1671_v7 = vld [vmem:[#allocation4 + $0x24] sm:$0xf]  ;;  %v1328_v22 = vor.u32 %v1669_v19, %v1325_v21 }
  0x4a   :  { %685 = vmatpush.bf16.msrb.mxu0 %v1348_v28  ;;  %v1336_v10 = vor.u32 %v1671_v7, %v1333_v9  ;;  %v1400_v28 = vor.u32 %v1687_v25, %v1397_v27 }
  0x4d   :  { %712 = vmatpush.bf16.msrb.mxu2 %v1360_v23  ;;  %v1395_v23 = vld [vmem:[#allocation4 + $0xa0] sm:$0xf] }
  0x4e   :  { %686 = vmatpush.bf16.msrb.mxu0 %v1340_v60  ;;  %v1396_v26 = vor.u32 %v1688_v24, %v1395_v23  ;;  %v1729_v60 = vld [vmem:[#allocation6 + $0xf4] sm:$0xf] }
  0x4f   :  { %v1568_v0 = vor.u32 %v1729_v60, %v1565_v61  ;;  %v1541_v60 = vld [vmem:[#allocation6 + $0xc8] sm:$0xf0] }
  0x50   :  { %v1544_v61 = vor.u32 %v1723_v59, %v1541_v60 }
  0x51   :  { %713 = vmatpush.bf16.msrb.mxu2 %v1352_v29  ;;  %v1315_v29 = vld [vmem:[#allocation4] sm:$0xf] }
  0x52   :  { %687 = vmatpush.bf16.msrb.mxu0 %v1332_v8 }
  0x55   :  { %714 = vmatpush.bf16.msrb.mxu2 %v1344_v62 }
  0x59   :  { %715 = vmatpush.bf16.msrb.mxu2 %v1336_v10  ;;  %v258_v10 = vperm.slane %v256_v5, 0 }
  0x5d   :  { %716 = vmatpush.bf16.msrb.mxu2 %v1328_v22 }
  0xa3   :  { %v139_v54 = vpop.f32.mrf.mxu2  ;;  %v153_v55 = vpop.f32.mrf.mxu3 }
  0xab   :  { %v141_v16 = vpop.f32.mrf.mxu2  ;;  %v155_v17 = vpop.f32.mrf.mxu3 }
  0xb3   :  { %v189_v30 = vpop.f32.mrf.mxu2  ;;  %v203_v31 = vpop.f32.mrf.mxu3 }
  0xb4   :  { %v190_v33 = vadd.f32 %v189_v30, %v139_v54  ;;  %v204_v35 = vadd.f32 %v203_v31, %v153_v55  ;;  %v1420_v54 = vor.u32 %v1694_v52, %v1419_v51  ;;  %v1421_v55 = vld [vmem:[#allocation4 + $0xd8] sm:$0xf0]  ;;  %v1668_v30 = vld [vmem:[#allocation4 + $0x4] sm:$0xf0]  ;;  %v1667_v31 = vld [vmem:[#allocation4 + $0x4] sm:$0xf] }
  0xb5   :  { %v1424_v56 = vor.u32 %v1693_v53, %v1421_v55  ;;  %v1316_v32 = vor.u32 %v1668_v30, %v1315_v29  ;;  %v1501_v51 = vld [vmem:[#allocation6 + $0x78] sm:$0xf0]  ;;  %v1491_v52 = vld [vmem:[#allocation6 + $0x60] sm:$0xf]  ;;  %v1712_v53 = vld [vmem:[#allocation6 + $0x64] sm:$0xf0] }
  0xb6   :  { %v214_v39 = vadd.f32 %v210_v34, %v190_v33  ;;  %v215_v40 = vadd.f32 %v211_v36, %v204_v35  ;;  %698 = vmatpush.bf16.msrb.mxu1 %v1420_v54  ;;  %v1317_v33 = vld [vmem:[#allocation4 + $0x8] sm:$0xf0]  ;;  %v1387_v35 = vld [vmem:[#allocation4 + $0x90] sm:$0xf]  ;;  %v1711_v55 = vld [vmem:[#allocation6 + $0x64] sm:$0xf]  ;;  %v1492_v58 = vor.u32 %v1712_v53, %v1491_v52 }
  0xb7   :  { %726 = vmatpush.bf16.msrb.mxu3 %v1424_v56  ;;  %v1493_v56 = vld [vmem:[#allocation6 + $0x68] sm:$0xf0]  ;;  %v1705_v52 = vld [vmem:[#allocation6 + $0x34] sm:$0xf] }
  0xb8   :  { %v218_v45 = vmax.f32 %v214_v39, 0.0  ;;  %v219_v46 = vmax.f32 %v215_v40, 0.0  ;;  %v1389_v39 = vld [vmem:[#allocation4 + $0x98] sm:$0xf0]  ;;  %v1496_v62 = vor.u32 %v1711_v55, %v1493_v56  ;;  %v1539_v56 = vld [vmem:[#allocation6 + $0xc0] sm:$0xf] }
  0xba   :  { %699 = vmatpush.bf16.msrb.mxu1 %v1412_v2  ;;  %v1710_v2 = vld [vmem:[#allocation6 + $0x54] sm:$0xf0] }
  0xbb   :  { %v191_v37 = vpop.f32.mrf.mxu2  ;;  %v205_v38 = vpop.f32.mrf.mxu3  ;;  %727 = vmatpush.bf16.msrb.mxu3 %v1416_v4  ;;  %v1485_v4 = vld [vmem:[#allocation6 + $0x58] sm:$0xf0]  ;;  %v1484_v6 = vor.u32 %v1710_v2, %v1483_v1  ;;  %v1461_v2 = vld [vmem:[#allocation6 + $0x28] sm:$0xf0] }
  0xbc   :  { %v192_v41 = vadd.f32 %v191_v37, %v141_v16  ;;  %v206_v42 = vadd.f32 %v205_v38, %v155_v17  ;;  %v1408_v16 = vor.u32 %v1689_v13, %v1405_v15  ;;  %v1323_v17 = vld [vmem:[#allocation4 + $0x10] sm:$0xf]  ;;  %v1685_v37 = vld [vmem:[#allocation4 + $0x94] sm:$0xf]  ;;  %v1488_v9 = vor.u32 %v1709_v3, %v1485_v4 }
  0xbd   :  { %v1324_v20 = vor.u32 %v1670_v18, %v1323_v17  ;;  %v1392_v40 = vor.u32 %v1685_v37, %v1389_v39  ;;  %v1708_v39 = vld [vmem:[#allocation6 + $0x44] sm:$0xf0]  ;;  %v1531_v4 = vld [vmem:[#allocation6 + $0xb0] sm:$0xf] }
  0xbe   :  { %v216_v43 = vadd.f32 %v210_v34, %v192_v41  ;;  %v217_v44 = vadd.f32 %v211_v36, %v206_v42  ;;  %700 = vmatpush.bf16.msrb.mxu1 %v1404_v14  ;;  %v1320_v34 = vor.u32 %v1667_v31, %v1317_v33  ;;  %v1686_v36 = vld [vmem:[#allocation4 + $0x94] sm:$0xf0]  ;;  %v1379_v41 = vld [vmem:[#allocation4 + $0x80] sm:$0xf]  ;;  %v1684_v42 = vld [vmem:[#allocation4 + $0x84] sm:$0xf0] }
  0xbf   :  { %728 = vmatpush.bf16.msrb.mxu3 %v1408_v16  ;;  %688 = vmatpush.bf16.msrb.mxu0 %v1324_v20  ;;  %v1388_v38 = vor.u32 %v1686_v36, %v1387_v35  ;;  %v259_v14 = vperm.slane %v256_v5, 1  ;;  %v1728_v33 = vld [vmem:[#allocation6 + $0xe4] sm:$0xf0]  ;;  %v1557_v36 = vld [vmem:[#allocation6 + $0xe8] sm:$0xf0] }
  0xc0   :  { %v220_v47 = vmax.f32 %v216_v43, 0.0  ;;  %v221_v48 = vmax.f32 %v217_v44, 0.0  ;;  %717 = vmatpush.bf16.msrb.mxu2 %v1320_v34  ;;  %v1683_v43 = vld [vmem:[#allocation4 + $0x84] sm:$0xf]  ;;  %v1380_v44 = vor.u32 %v1684_v42, %v1379_v41  ;;  %v1477_v42 = vld [vmem:[#allocation6 + $0x48] sm:$0xf0] }
  0xc1   :  { %v1727_v34 = vld [vmem:[#allocation6 + $0xe4] sm:$0xf]  ;;  %v1722_v5 = vld [vmem:[#allocation6 + $0xb4] sm:$0xf0] }
  0xc2   :  { %v222_v49 = vpack.c.bf16 %v220_v47, %v218_v45  ;;  %v223_v50 = vpack.c.bf16 %v221_v48, %v219_v46  ;;  %701 = vmatpush.bf16.msrb.mxu1 %v1396_v26  ;;  %v1381_v45 = vld [vmem:[#allocation4 + $0x88] sm:$0xf0]  ;;  %v1499_v47 = vld [vmem:[#allocation6 + $0x70] sm:$0xf]  ;;  %v1714_v48 = vld [vmem:[#allocation6 + $0x74] sm:$0xf0]  ;;  %v1560_v37 = vor.u32 %v1727_v34, %v1557_v36 }
  0xc3   :  { %729 = vmatpush.bf16.msrb.mxu3 %v1400_v28  ;;  %689 = vmatpush.bf16.msrb.mxu0 %v1316_v32  ;;  %v1384_v46 = vor.u32 %v1683_v43, %v1381_v45  ;;  %v1555_v32 = vld [vmem:[#allocation6 + $0xe0] sm:$0xf]  ;;  %v1547_v43 = vld [vmem:[#allocation6 + $0xd0] sm:$0xf]  ;;  %v1715_v36 = vld [vmem:[#allocation6 + $0x84] sm:$0xf] }
  0xc4   :  { %430 = vmatmul.bf16.vlgmr.msra.gmra.mxu0 %v222_v49  ;;  %444 = vmatmul.bf16.vlgmr.msra.gmra.mxu1 %v223_v50  ;;  %v1556_v35 = vor.u32 %v1728_v33, %v1555_v32  ;;  %v1517_v32 = vld [vmem:[#allocation6 + $0x98] sm:$0xf0]  ;;  %v1507_v34 = vld [vmem:[#allocation6 + $0x80] sm:$0xf] }
  0xc5   :  { %458 = vmatmul.bf16.vlgmr.msra.gmra.mxu2 %v222_v49  ;;  %472 = vmatmul.bf16.vlgmr.msra.gmra.mxu3 %v223_v50  ;;  %v1713_v49 = vld [vmem:[#allocation6 + $0x74] sm:$0xf]  ;;  %v1500_v50 = vor.u32 %v1714_v48, %v1499_v47  ;;  %v1549_v48 = vld [vmem:[#allocation6 + $0xd8] sm:$0xf0] }
  0xc6   :  { %702 = vmatpush.bf16.msrb.mxu1 %v1388_v38  ;;  %v1504_v54 = vor.u32 %v1713_v49, %v1501_v51  ;;  %v1475_v38 = vld [vmem:[#allocation6 + $0x40] sm:$0xf]  ;;  %v1725_v47 = vld [vmem:[#allocation6 + $0xd4] sm:$0xf]  ;;  %v1706_v51 = vld [vmem:[#allocation6 + $0x34] sm:$0xf0] }
  0xc7   :  { %730 = vmatpush.bf16.msrb.mxu3 %v1392_v40  ;;  %942 = vmatpush.bf16.msra.mxu0 %v1500_v50  ;;  %v1707_v40 = vld [vmem:[#allocation6 + $0x44] sm:$0xf]  ;;  %v1476_v41 = vor.u32 %v1708_v39, %v1475_v38  ;;  %v1552_v49 = vor.u32 %v1725_v47, %v1549_v48  ;;  %v1467_v50 = vld [vmem:[#allocation6 + $0x30] sm:$0xf]  ;;  %v1509_v38 = vld [vmem:[#allocation6 + $0x88] sm:$0xf0] }
  0xc8   :  { %970 = vmatpush.bf16.msra.mxu2 %v1504_v54  ;;  %v1480_v45 = vor.u32 %v1707_v40, %v1477_v42  ;;  %v1468_v53 = vor.u32 %v1706_v51, %v1467_v50  ;;  %v1469_v54 = vld [vmem:[#allocation6 + $0x38] sm:$0xf0]  ;;  %v1512_v39 = vor.u32 %v1715_v36, %v1509_v38  ;;  %v1737_v42 = vld [vmem:[#allocation7 + $0x30] sm:$0xff] }
  0xc9   :  { %v1472_v55 = vor.u32 %v1705_v52, %v1469_v54  ;;  %v1738_v40 = vld [vmem:[#allocation7 + $0x38] sm:$0xff] }
  0xca   :  { %703 = vmatpush.bf16.msrb.mxu1 %v1380_v44  ;;  %v1726_v44 = vld [vmem:[#allocation6 + $0xd4] sm:$0xf0] }
  0xcb   :  { %731 = vmatpush.bf16.msrb.mxu3 %v1384_v46  ;;  %943 = vmatpush.bf16.msra.mxu0 %v1492_v58  ;;  %v1548_v46 = vor.u32 %v1726_v44, %v1547_v43  ;;  %v1540_v58 = vor.u32 %v1724_v57, %v1539_v56  ;;  %v1736_v44 = vld [vmem:[#allocation7 + $0x28] sm:$0xff] }
  0xcc   :  { %971 = vmatpush.bf16.msra.mxu2 %v1496_v62  ;;  %v1459_v62 = vld [vmem:[#allocation6 + $0x20] sm:$0xf] }
  0xce   :  { %956 = vmatpush.bf16.msra.mxu1 %v1564_v63  ;;  %v1704_v63 = vld [vmem:[#allocation6 + $0x24] sm:$0xf0] }
  0xcf   :  { %984 = vmatpush.bf16.msra.mxu3 %v1568_v0  ;;  %944 = vmatpush.bf16.msra.mxu0 %v1484_v6  ;;  %v1703_v0 = vld [vmem:[#allocation6 + $0x24] sm:$0xf]  ;;  %v1460_v1 = vor.u32 %v1704_v63, %v1459_v62  ;;  %v1721_v6 = vld [vmem:[#allocation6 + $0xb4] sm:$0xf] }
  0xd0   :  { %972 = vmatpush.bf16.msra.mxu2 %v1488_v9  ;;  %v1464_v3 = vor.u32 %v1703_v0, %v1461_v2 }
  0xd2   :  { %957 = vmatpush.bf16.msra.mxu1 %v1556_v35  ;;  %v1716_v35 = vld [vmem:[#allocation6 + $0x84] sm:$0xf0] }
  0xd3   :  { %985 = vmatpush.bf16.msra.mxu3 %v1560_v37  ;;  %945 = vmatpush.bf16.msra.mxu0 %v1476_v41  ;;  %v1508_v37 = vor.u32 %v1716_v35, %v1507_v34  ;;  %v1746_v41 = vld [vmem:[#allocation7 + $0x78] sm:$0xff] }
  0xd4   :  { %973 = vmatpush.bf16.msra.mxu2 %v1480_v45  ;;  %v516_v45 = vld [vmem:[%s2006_s8] sm:$0x3] }
  0xd5   :  { %v518_v48 = vperm.slane %v516_v45, 0 }
  0xd6   :  { %958 = vmatpush.bf16.msra.mxu1 %v1548_v46 }
  0xd7   :  { %986 = vmatpush.bf16.msra.mxu3 %v1552_v49  ;;  %946 = vmatpush.bf16.msra.mxu0 %v1468_v53  ;;  %v519_v53 = vperm.slane %v516_v45, 1 }
  0xd8   :  { %974 = vmatpush.bf16.msra.mxu2 %v1472_v55 }
  0xda   :  { %959 = vmatpush.bf16.msra.mxu1 %v1540_v58 }
  0xdb   :  { %987 = vmatpush.bf16.msra.mxu3 %v1544_v61  ;;  %947 = vmatpush.bf16.msra.mxu0 %v1460_v1 }
  0xdc   :  { %975 = vmatpush.bf16.msra.mxu2 %v1464_v3 }
 0x141   :  { %v431_v7 = vpop.f32.mrf.mxu0  ;;  %v445_v8 = vpop.f32.mrf.mxu1 }
 0x142   :  { %v432_v11 = vadd.f32 %v431_v7, %v258_v10  ;;  %v1532_v7 = vor.u32 %v1722_v5, %v1531_v4  ;;  %v1745_v5 = vld [vmem:[#allocation7 + $0x70] sm:$0xff] }
 0x144   :  { %v446_v16 = vadd.f32 %v445_v8, %v432_v11  ;;  %v1533_v8 = vld [vmem:[#allocation6 + $0xb8] sm:$0xf0]  ;;  %v1702_v11 = vld [vmem:[#allocation6 + $0x14] sm:$0xf0]  ;;  %960 = vmatpush.bf16.msra.mxu1 %v1532_v7  ;;  %v1744_v7 = vld [vmem:[#allocation7 + $0x68] sm:$0xff] }
 0x145   :  { %v1536_v9 = vor.u32 %v1721_v6, %v1533_v8  ;;  %v1735_v6 = vld [vmem:[#allocation7 + $0x20] sm:$0xff]  ;;  %v1734_v8 = vld [vmem:[#allocation7 + $0x18] sm:$0xff] }
 0x146   :  { %v478_v21 = vmax.f32 %v446_v16, 0.0  ;;  %v1523_v16 = vld [vmem:[#allocation6 + $0xa0] sm:$0xf] }
 0x147   :  { %988 = vmatpush.bf16.msra.mxu3 %v1536_v9  ;;  %v1743_v9 = vld [vmem:[#allocation7 + $0x60] sm:$0xff] }
 0x148   :  { %v459_v12 = vpop.f32.mrf.mxu2  ;;  %v473_v13 = vpop.f32.mrf.mxu3 }
 0x149   :  { %v433_v15 = vpop.f32.mrf.mxu0  ;;  %v447_v18 = vpop.f32.mrf.mxu1  ;;  %v460_v20 = vadd.f32 %v459_v12, %v259_v14  ;;  %v1701_v12 = vld [vmem:[#allocation6 + $0x14] sm:$0xf] }
 0x14a   :  { %v434_v17 = vadd.f32 %v433_v15, %v258_v10  ;;  %v1451_v10 = vld [vmem:[#allocation6 + $0x10] sm:$0xf] }
 0x14b   :  { %v474_v25 = vadd.f32 %v473_v13, %v460_v20  ;;  %v1452_v13 = vor.u32 %v1702_v11, %v1451_v10  ;;  %v1525_v20 = vld [vmem:[#allocation6 + $0xa8] sm:$0xf0]  ;;  %v1733_v10 = vld [vmem:[#allocation7 + $0x10] sm:$0xff]  ;;  %v1742_v11 = vld [vmem:[#allocation7 + $0x58] sm:$0xff] }
 0x14c   :  { %v448_v19 = vadd.f32 %v447_v18, %v434_v17  ;;  %v1720_v17 = vld [vmem:[#allocation6 + $0xa4] sm:$0xf0]  ;;  %v1719_v18 = vld [vmem:[#allocation6 + $0xa4] sm:$0xf] }
 0x14d   :  { %v479_v29 = vmax.f32 %v474_v25, 0.0  ;;  %948 = vmatpush.bf16.msra.mxu0 %v1452_v13  ;;  %v1741_v13 = vld [vmem:[#allocation7 + $0x50] sm:$0xff] }
 0x14e   :  { %v480_v22 = vmax.f32 %v448_v19, 0.0  ;;  %v1524_v19 = vor.u32 %v1720_v17, %v1523_v16  ;;  %v1739_v16 = vld [vmem:[#allocation7 + $0x40] sm:$0xff] }
 0x150   :  { %v482_v23 = vpack.c.bf16 %v480_v22, %v478_v21  ;;  %v461_v24 = vpop.f32.mrf.mxu2  ;;  %v475_v27 = vpop.f32.mrf.mxu3  ;;  %v1528_v21 = vor.u32 %v1719_v18, %v1525_v20  ;;  %v1443_v22 = vld [vmem:[#allocation6] sm:$0xf]  ;;  %961 = vmatpush.bf16.msra.mxu1 %v1524_v19  ;;  %v776_v18 = vld [vmem:[%s2008_s10] sm:$0x3] }
 0x151   :  { %v462_v26 = vadd.f32 %v461_v24, %v259_v14  ;;  %v1453_v14 = vld [vmem:[#allocation6 + $0x18] sm:$0xf0]  ;;  %v1699_v24 = vld [vmem:[#allocation6 + $0x4] sm:$0xf] }
 0x152   :  { %690 = vmatmul.bf16.vlgmr.msrb.gmra.mxu0 %v482_v23  ;;  %718 = vmatmul.bf16.vlgmr.msrb.gmra.mxu2 %v482_v23  ;;  %v1456_v15 = vor.u32 %v1701_v12, %v1453_v14  ;;  %v1700_v23 = vld [vmem:[#allocation6 + $0x4] sm:$0xf0]  ;;  %v1731_v14 = vld [vmem:[#allocation7] sm:$0xff] }
 0x153   :  { %v476_v28 = vadd.f32 %v475_v27, %v462_v26  ;;  %v1444_v25 = vor.u32 %v1700_v23, %v1443_v22  ;;  %v1445_v26 = vld [vmem:[#allocation6 + $0x8] sm:$0xf0]  ;;  %989 = vmatpush.bf16.msra.mxu3 %v1528_v21  ;;  %v778_v21 = vperm.slane %v776_v18, 0 }
 0x154   :  { %976 = vmatpush.bf16.msra.mxu2 %v1456_v15  ;;  %v1448_v27 = vor.u32 %v1699_v24, %v1445_v26  ;;  %v1732_v12 = vld [vmem:[#allocation7 + $0x8] sm:$0xff]  ;;  %v779_v26 = vperm.slane %v776_v18, 1 }
 0x155   :  { %v481_v30 = vmax.f32 %v476_v28, 0.0  ;;  %v1515_v28 = vld [vmem:[#allocation6 + $0x90] sm:$0xf]  ;;  %949 = vmatpush.bf16.msra.mxu0 %v1444_v25  ;;  %v1740_v15 = vld [vmem:[#allocation7 + $0x48] sm:$0xff] }
 0x157   :  { %v483_v31 = vpack.c.bf16 %v481_v30, %v479_v29  ;;  %v1718_v29 = vld [vmem:[#allocation6 + $0x94] sm:$0xf0]  ;;  %v1717_v30 = vld [vmem:[#allocation6 + $0x94] sm:$0xf] }
 0x158   :  { %977 = vmatpush.bf16.msra.mxu2 %v1448_v27  ;;  %v1520_v33 = vor.u32 %v1717_v30, %v1517_v32 }
 0x159   :  { %704 = vmatmul.bf16.vlgmr.msrb.gmra.mxu1 %v483_v31  ;;  %732 = vmatmul.bf16.vlgmr.msrb.gmra.mxu3 %v483_v31  ;;  %v1516_v31 = vor.u32 %v1718_v29, %v1515_v28 }
 0x15a   :  { %990 = vmatpush.bf16.msra.mxu3 %v1520_v33  ;;  %1136 = vmatpush.bf16.msrb.mxu0 %v1738_v40 }
 0x15b   :  { %962 = vmatpush.bf16.msra.mxu1 %v1516_v31 }
 0x15e   :  { %991 = vmatpush.bf16.msra.mxu3 %v1512_v39  ;;  %1137 = vmatpush.bf16.msrb.mxu0 %v1737_v42 }
 0x15f   :  { %963 = vmatpush.bf16.msra.mxu1 %v1508_v37 }
 0x162   :  { %1138 = vmatpush.bf16.msrb.mxu0 %v1736_v44 }
 0x163   :  { %1150 = vmatpush.bf16.msrb.mxu1 %v1746_v41 }
 0x166   :  { %1139 = vmatpush.bf16.msrb.mxu0 %v1735_v6 }
 0x167   :  { %1151 = vmatpush.bf16.msrb.mxu1 %v1745_v5 }
 0x16a   :  { %1140 = vmatpush.bf16.msrb.mxu0 %v1734_v8 }
 0x16b   :  { %1152 = vmatpush.bf16.msrb.mxu1 %v1744_v7 }
 0x16e   :  { %1141 = vmatpush.bf16.msrb.mxu0 %v1733_v10 }
 0x16f   :  { %1153 = vmatpush.bf16.msrb.mxu1 %v1743_v9 }
 0x172   :  { %1142 = vmatpush.bf16.msrb.mxu0 %v1732_v12 }
 0x173   :  { %1154 = vmatpush.bf16.msrb.mxu1 %v1742_v11 }
 0x176   :  { %1143 = vmatpush.bf16.msrb.mxu0 %v1731_v14 }
 0x177   :  { %1155 = vmatpush.bf16.msrb.mxu1 %v1741_v13 }
 0x17b   :  { %1156 = vmatpush.bf16.msrb.mxu1 %v1740_v15 }
 0x17f   :  { %1157 = vmatpush.bf16.msrb.mxu1 %v1739_v16 }
 0x1cf   :  { %v691_v43 = vpop.f32.mrf.mxu0 }
 0x1d0   :  { %v692_v50 = vadd.f32 %v691_v43, %v518_v48  ;;  %v1756_v43 = vld [vmem:[%s2010_s12] ss:$0 sm:$0xff] }
 0x1d5   :  { %v719_v47 = vpop.f32.mrf.mxu2 }
 0x1d6   :  { %v705_v46 = vpop.f32.mrf.mxu1  ;;  %v720_v59 = vadd.f32 %v719_v47, %v519_v53 }
 0x1d7   :  { %v693_v49 = vpop.f32.mrf.mxu0  ;;  %v706_v52 = vadd.f32 %v705_v46, %v692_v50 }
 0x1d8   :  { %v694_v54 = vadd.f32 %v693_v49, %v518_v48 }
 0x1d9   :  { %v738_v58 = vmax.f32 %v706_v52, 0.0 }
 0x1dc   :  { %v733_v51 = vpop.f32.mrf.mxu3 }
 0x1dd   :  { %v721_v57 = vpop.f32.mrf.mxu2  ;;  %v734_v61 = vadd.f32 %v733_v51, %v720_v59 }
 0x1de   :  { %v707_v55 = vpop.f32.mrf.mxu1  ;;  %v722_v63 = vadd.f32 %v721_v57, %v519_v53 }
 0x1df   :  { %v708_v56 = vadd.f32 %v707_v55, %v694_v54  ;;  %v739_v2 = vmax.f32 %v734_v61, 0.0 }
 0x1e1   :  { %v740_v60 = vmax.f32 %v708_v56, 0.0 }
 0x1e3   :  { %v742_v62 = vpack.c.bf16 %v740_v60, %v738_v58 }
 0x1e4   :  { %v735_v0 = vpop.f32.mrf.mxu3 }
 0x1e5   :  { %v736_v1 = vadd.f32 %v735_v0, %v722_v63  ;;  %950 = vmatmul.bf16.vlgmr.msra.gmra.mxu0 %v742_v62  ;;  %978 = vmatmul.bf16.vlgmr.msra.gmra.mxu2 %v742_v62 }
 0x1e7   :  { %v741_v3 = vmax.f32 %v736_v1, 0.0 }
 0x1e9   :  { %v743_v4 = vpack.c.bf16 %v741_v3, %v739_v2 }
 0x1eb   :  { %964 = vmatmul.bf16.vlgmr.msra.gmra.mxu1 %v743_v4  ;;  %992 = vmatmul.bf16.vlgmr.msra.gmra.mxu3 %v743_v4 }
 0x262   :  { %v951_v17 = vpop.f32.mrf.mxu0 }
 0x263   :  { %v952_v23 = vadd.f32 %v951_v17, %v778_v21 }
 0x268   :  { %v965_v19 = vpop.f32.mrf.mxu1  ;;  %v979_v20 = vpop.f32.mrf.mxu2 }
 0x269   :  { %v966_v25 = vadd.f32 %v965_v19, %v952_v23  ;;  %v980_v32 = vadd.f32 %v979_v20, %v779_v26 }
 0x26a   :  { %v953_v22 = vpop.f32.mrf.mxu0 }
 0x26b   :  { %v954_v27 = vadd.f32 %v953_v22, %v778_v21  ;;  %v998_v31 = vmax.f32 %v966_v25, 0.0 }
 0x26e   :  { %v993_v24 = vpop.f32.mrf.mxu3 }
 0x26f   :  { %v994_v34 = vadd.f32 %v993_v24, %v980_v32 }
 0x270   :  { %v967_v28 = vpop.f32.mrf.mxu1  ;;  %v981_v30 = vpop.f32.mrf.mxu2 }
 0x271   :  { %v968_v29 = vadd.f32 %v967_v28, %v954_v27  ;;  %v982_v36 = vadd.f32 %v981_v30, %v779_v26  ;;  %v999_v39 = vmax.f32 %v994_v34, 0.0 }
 0x273   :  { %v1000_v33 = vmax.f32 %v968_v29, 0.0 }
 0x275   :  { %v1002_v35 = vpack.c.bf16 %v1000_v33, %v998_v31 }
 0x276   :  { %v995_v37 = vpop.f32.mrf.mxu3 }
 0x277   :  { %v996_v38 = vadd.f32 %v995_v37, %v982_v36  ;;  %1144 = vmatmul.bf16.vlgmr.msrb.gmra.mxu0 %v1002_v35 }
 0x279   :  { %v1001_v40 = vmax.f32 %v996_v38, 0.0 }
 0x27b   :  { %v1003_v41 = vpack.c.bf16 %v1001_v40, %v999_v39 }
 0x27d   :  { %1158 = vmatmul.bf16.vlgmr.msrb.gmra.mxu1 %v1003_v41 }
 0x2f4   :  { %v1145_v42 = vpop.f32.mrf.mxu0 }
 0x2f5   :  { %v1146_v44 = vadd.f32 %v1756_v43, %v1145_v42 }
 0x2fa   :  { %v1159_v45 = vpop.f32.mrf.mxu1 }
 0x2fb   :  { %v1160_v46 = vadd.f32 %v1159_v45, %v1146_v44 }
 0x2fc   :  { %v1147_v47 = vpop.f32.mrf.mxu0 }
 0x2fd   :  { %1164 = vst [vmem:[%s2011_s13] sm:$0xff] %v1160_v46  ;;  %v1148_v48 = vadd.f32 %v1756_v43, %v1147_v47 }
 0x302   :  { %v1161_v49 = vpop.f32.mrf.mxu1 }
 0x303   :  { %v1162_v50 = vadd.f32 %v1161_v49, %v1148_v48 }
 0x305   :  { %1165 = vst [vmem:[%s2011_s13 + $0x8] sm:$0xff] %v1162_v50 }
 0x306   :  { %1170 = vsyncpa [#allocation3], 1 }
 0x307   :  { %1171 = vsyncpa [#allocation5], 1 }
 0x308   :  { %1172 = vsyncpa [#allocation8], 1 }

</bundles_post_ra>
